<compile_context>
chip_gen: v7x
topology: tpu7x:2x2x1
jax: 0.10.0
libtpu: 0.0.40
codegen_flags: <defaults>
</compile_context>

<pallas_src>
import jax
import jax.numpy as jnp
from jax.experimental import pallas as pl
from jax.experimental.pallas import tpu as pltpu

# -------- module constants (from the PyTorch reference) --------
K_CONV1_N = 32            # out channels
K_DIM = 7                 # conv kernel size
TOT_VOXELS_FLAT = 28542   # icaconv_orig in-channels
N_REDUCED = 25            # icaconv_red in-channels

# -------- tiling constants (fixed at init time) --------
LANE = 128
NF = K_CONV1_N * K_DIM                                    # 224
NF_PAD = ((NF + LANE - 1) // LANE) * LANE                 # 256 (lane-dense)

EVAL_PARTS = 2            # leading "parallel" grid axis (2 TCs on v7x)
TC_EVAL = 2048            # C_in tile for the eval (28542-channel) conv
C_PAD_ORIG = -(-TOT_VOXELS_FLAT // (EVAL_PARTS * TC_EVAL)) * (EVAL_PARTS * TC_EVAL)  # 28672
C_PAD_RED = 32            # C_in pad for the 25-channel training conv

TK_REDUCE = 14336         # contraction tile for the (dead-code) reduce matmul
assert C_PAD_ORIG % TK_REDUCE == 0


# =====================================================================
# Direct Conv1d kernel: contract over C_in tiles, K per-tap MXU dots.
# =====================================================================
def _dconv_kernel(w_ref, x_ref, o_ref):
    # w_ref: (K, C_out, tc)   x_ref: (tc, N*L)   o_ref: (1, K, C_out, N*L) f32
    # o_ref's block index is constant across the contraction axis (axis 1):
    # it stays VMEM-resident and accumulates.
    @pl.when(pl.program_id(1) == 0)
    def _():
        o_ref[...] = jnp.zeros_like(o_ref)

    x = x_ref[...]
    for k in range(w_ref.shape[0]):            # K=7 static taps
        o_ref[0, k, :, :] += jnp.dot(w_ref[k], x,
                                     preferred_element_type=jnp.float32)


def prep_conv_weight(weight, c_pad, dtype):
    """One-time init prep: (C_out, C_in, K) -> (K, C_out, c_pad) in `dtype`.
    Hoists the transpose / zero-pad / cast out of the per-call path."""
    c_out, c_in, k_dim = weight.shape
    wt = jnp.transpose(weight, (2, 0, 1))                 # (K, C_out, C_in)
    wt = jnp.pad(wt, ((0, 0), (0, 0), (0, c_pad - c_in)))
    return wt.astype(dtype)


def conv1d_direct(x, wt, bias, *, parts=1, tc=None):
    """Conv1d (cross-correlation, stride 1, VALID), x: (N, C_in, L),
    wt: (K, C_out, C_pad) from prep_conv_weight, bias: (C_out,)
    -> (N, C_out, L - K + 1)."""
    n, c_in, l = x.shape
    k_dim, c_out, c_pad = wt.shape
    l_out = l - k_dim + 1
    nl = n * l
    if tc is None:
        tc = c_pad // parts
    assert c_pad % (parts * tc) == 0
    nk = c_pad // (parts * tc)

    # Layout plumbing only (no im2col): channels onto sublanes, N*L onto lanes.
    x2 = jnp.transpose(x, (1, 0, 2)).reshape(c_in, nl)
    x2 = jnp.pad(x2, ((0, c_pad - c_in), (0, 0))).astype(wt.dtype)

    slabs = pl.pallas_call(
        _dconv_kernel,
        out_shape=jax.ShapeDtypeStruct((parts, k_dim, c_out, nl), jnp.float32),
        grid_spec=pltpu.PrefetchScalarGridSpec(
            num_scalar_prefetch=0,
            grid=(parts, nk),
            in_specs=[
                pl.BlockSpec((k_dim, c_out, tc), lambda p, kk: (0, 0, p * nk + kk)),
                pl.BlockSpec((tc, nl), lambda p, kk: (p * nk + kk, 0)),
            ],
            out_specs=pl.BlockSpec((1, k_dim, c_out, nl),
                                   lambda p, kk: (p, 0, 0, 0)),
        ),
        compiler_params=pltpu.CompilerParams(
            dimension_semantics=("parallel", "arbitrary")),
    )(wt, x2)

    # Tiny epilogue (fuses under jit): sum partial parts, per-tap shift-sum,
    # bias, back to (N, C_out, L_out).
    s = slabs.sum(axis=0).reshape(k_dim, c_out, n, l)
    out = s[0, :, :, :l_out]
    for k in range(1, k_dim):
        out = out + s[k, :, :, k:k + l_out]
    out = out + bias.astype(jnp.float32)[:, None, None]
    return jnp.transpose(out, (1, 0, 2)).astype(x.dtype)


# =====================================================================
# Reduced-weight matmul (the reference's *discarded* clone_weight_red)
# =====================================================================
def _reduce_kernel(a_ref, b_ref, o_ref):
    # a_ref: (n_red, tk) bf16   b_ref: (tk, NF_PAD) bf16   o_ref: (n_red, NF_PAD) f32
    @pl.when(pl.program_id(0) == 0)
    def _():
        o_ref[...] = jnp.zeros_like(o_ref)
    o_ref[...] += jnp.dot(a_ref[...], b_ref[...],
                          preferred_element_type=jnp.float32)


def prepare_orig_weights(w_orig):
    """One-time init prep: (C_out, K_tot, K) -> (C_PAD_ORIG, NF_PAD) bf16 with
    column layout o*K_DIM + d and zero padding."""
    c_out, k_tot, k_dim = w_orig.shape
    nf = c_out * k_dim
    b_flat = jnp.transpose(w_orig, (1, 0, 2)).reshape(k_tot, nf)
    b_flat = jnp.pad(b_flat, ((0, C_PAD_ORIG - k_tot), (0, NF_PAD - nf)))
    return b_flat.astype(jnp.bfloat16)


def pad_ica_matrix(ica_matrix):
    """One-time pad/cast of the (n_red, K_tot) ICA matrix to (n_red, C_PAD_ORIG) bf16."""
    n_red, k_tot = ica_matrix.shape
    return jnp.pad(ica_matrix,
                   ((0, 0), (0, C_PAD_ORIG - k_tot))).astype(jnp.bfloat16)


def reduce_orig_weights_pallas(ica_matrix, w_orig_red, *, tk=TK_REDUCE):
    """clone_weight_red[i] = ica_matrix @ w_orig[i] -> (C_out, n_red, K_DIM)."""
    n_red, k_a = ica_matrix.shape
    k_pad, nf_pad = w_orig_red.shape
    assert k_pad % tk == 0
    a = ica_matrix if k_a == k_pad else jnp.pad(ica_matrix,
                                                ((0, 0), (0, k_pad - k_a)))
    a = a.astype(w_orig_red.dtype)

    out = pl.pallas_call(
        _reduce_kernel,
        out_shape=jax.ShapeDtypeStruct((n_red, nf_pad), jnp.float32),
        grid_spec=pltpu.PrefetchScalarGridSpec(
            num_scalar_prefetch=0,
            grid=(k_pad // tk,),
            in_specs=[
                pl.BlockSpec((n_red, tk), lambda k: (0, k)),
                pl.BlockSpec((tk, nf_pad), lambda k: (k, 0)),
            ],
            out_specs=pl.BlockSpec((n_red, nf_pad), lambda k: (0, 0)),
        ),
        compiler_params=pltpu.CompilerParams(
            dimension_semantics=("arbitrary",),
            vmem_limit_bytes=30 * 1024 * 1024),   # clears v5e's 16 MiB default
    )(a, w_orig_red)
    return out[:, :NF].reshape(n_red, K_CONV1_N, K_DIM).transpose(1, 0, 2)


# =====================================================================
# module wrapper
# =====================================================================
def ica_grouping_forward(params, x, ica_matrix=None, training=True,
                         compute_clone_weight=False):
    if training:
        if compute_clone_weight:
            # Faithful to the reference's dead code: clone_weight_red is built
            # and then discarded (output uses the untouched icaconv_red
            # weights). Skipped by default (jit would DCE it anyway).
            _ = reduce_orig_weights_pallas(ica_matrix, params["w_orig_red"])
        # TODO(synk): autograd.Variable / retain_grad bookkeeping has no forward effect; omitted.
        return conv1d_direct(x, params["w_red_conv"], params["b_red"], parts=1)
    return conv1d_direct(x, params["w_orig_conv"], params["b_orig"],
                         parts=EVAL_PARTS, tc=TC_EVAL)


def init_params(key):
    k1, k2, k3, k4 = jax.random.split(key, 4)
    fan_red = N_REDUCED * K_DIM
    fan_orig = TOT_VOXELS_FLAT * K_DIM
    w_red = jax.random.uniform(k1, (K_CONV1_N, N_REDUCED, K_DIM), jnp.float32,
                               -1.0, 1.0) / jnp.sqrt(fan_red)
    b_red = jax.random.uniform(k2, (K_CONV1_N,), jnp.float32,
                               -1.0, 1.0) / jnp.sqrt(fan_red)
    w_orig = jax.random.uniform(k3, (K_CONV1_N, TOT_VOXELS_FLAT, K_DIM),
                                jnp.float32, -1.0, 1.0) / jnp.sqrt(fan_orig)
    b_orig = jax.random.uniform(k4, (K_CONV1_N,), jnp.float32,
                                -1.0, 1.0) / jnp.sqrt(fan_orig)
    return dict(
        w_red=w_red, b_red=b_red, w_orig=w_orig, b_orig=b_orig,
        # init-time layout prep (hoisted out of the per-call path):
        w_red_conv=prep_conv_weight(w_red, C_PAD_RED, jnp.float32),     # tiny, f32
        w_orig_conv=prep_conv_weight(w_orig, C_PAD_ORIG, jnp.bfloat16),  # 12.8 MB stream
        w_orig_red=prepare_orig_weights(w_orig),                         # 14.7 MB stream
    )


if __name__ == "__main__":
    key = jax.random.PRNGKey(0)
    pkey, xkey, ikey, ekey = jax.random.split(key, 4)
    params = init_params(pkey)

    batch, length = 2, 16
    l_out = length - K_DIM + 1
    x = jax.random.normal(xkey, (batch, N_REDUCED, length), jnp.float32)
    ica_matrix = 0.01 * jax.random.normal(
        ikey, (N_REDUCED, TOT_VOXELS_FLAT), jnp.float32)
    ica_padded = pad_ica_matrix(ica_matrix)   # one-time pad/cast, out of call path

    # ---- training branch forward (f32 kernel) ----
    fwd_train = jax.jit(lambda p, xx: ica_grouping_forward(p, xx, training=True))
    out = jax.block_until_ready(fwd_train(params, x))
    assert out.shape == (batch, K_CONV1_N, l_out)
    ref = jax.lax.conv_general_dilated(
        x, params["w_red"], window_strides=(1,), padding="VALID",
        dimension_numbers=("NCH", "OIH", "NCH"),
        precision=jax.lax.Precision.HIGHEST) + params["b_red"][None, :, None]
    assert jnp.allclose(out, ref, atol=1e-4, rtol=1e-4), "reduced conv mismatch"

    # ---- the (discarded-in-reference) reduced-weight kernel (bf16 streams) ----
    red = jax.block_until_ready(
        jax.jit(reduce_orig_weights_pallas)(ica_padded, params["w_orig_red"]))
    assert red.shape == (K_CONV1_N, N_REDUCED, K_DIM)
    ica_b = ica_matrix.astype(jnp.bfloat16).astype(jnp.float32)
    w_orig_b = params["w_orig"].astype(jnp.bfloat16).astype(jnp.float32)
    red_ref = jnp.einsum("vk,okd->ovd", ica_b, w_orig_b,
                         precision=jax.lax.Precision.HIGHEST)
    assert jnp.allclose(red, red_ref, atol=1e-4, rtol=1e-2), "reduced-weight mismatch"

    # ---- eval branch forward (icaconv_orig: 28542 in-channels, bf16 streams) ----
    x_orig = jax.random.normal(ekey, (batch, TOT_VOXELS_FLAT, length), jnp.float32)
    fwd_eval = jax.jit(lambda p, xx: ica_grouping_forward(p, xx, training=False))
    out_e = jax.block_until_ready(fwd_eval(params, x_orig))
    assert out_e.shape == (batch, K_CONV1_N, l_out)
    # Reference computed from the same bf16-rounded operands (f32 accumulation),
    # so the check validates kernel indexing rather than quantization error.
    x_orig_b = x_orig.astype(jnp.bfloat16).astype(jnp.float32)
    ref_e = jax.lax.conv_general_dilated(
        x_orig_b, w_orig_b, window_strides=(1,), padding="VALID",
        dimension_numbers=("NCH", "OIH", "NCH"),
        precision=jax.lax.Precision.HIGHEST) + params["b_orig"][None, :, None]
    assert jnp.allclose(out_e, ref_e, atol=2e-3, rtol=1e-3), "orig conv mismatch"

    print("KERNEL_OK")
</pallas_src>

<mosaic_0001>
module attributes {stable_mosaic.version = 11 : i64} {
  func.func @_dconv_kernel(%arg0: i32, %arg1: i32, %arg2: memref<7x32x32xf32, #tpu.memory_space<vmem>>, %arg3: memref<32x32xf32, #tpu.memory_space<vmem>>, %arg4: memref<1x7x32x32xf32, #tpu.memory_space<vmem>>) attributes {dimension_semantics = [#tpu.dimension_semantics<parallel>, #tpu.dimension_semantics<arbitrary>], iteration_bounds = array<i64: 1, 1>, scalar_prefetch = 0 : i64, scratch_operands = 0 : i64, tpu.core_type = #tpu.core_type<tc>, window_params = [{transform_indices = @transform_0, window_bounds = array<i64: 7, 32, 32>}, {transform_indices = @transform_1, window_bounds = array<i64: 32, 32>}, {transform_indices = @transform_2, window_bounds = array<i64: 1, 7, 32, 32>}]} {
    %c0_i32 = arith.constant 0 : i32
    %0 = arith.cmpi eq, %arg1, %c0_i32 : i32
    %1 = arith.extui %0 : i1 to i32
    %c0_i32_0 = arith.constant 0 : i32
    %2 = arith.cmpi ne, %1, %c0_i32_0 : i32
    scf.if %2 {
      %cst_79 = arith.constant 0.000000e+00 : f32
      %67 = vector.broadcast %cst_79 : f32 to vector<1x7x32x32xf32>
      %c0_80 = arith.constant 0 : index
      %c0_81 = arith.constant 0 : index
      %c0_82 = arith.constant 0 : index
      %c0_83 = arith.constant 0 : index
      %68 = vector.load %arg4[%c0_80, %c0_81, %c0_82, %c0_83] : memref<1x7x32x32xf32, #tpu.memory_space<vmem>>, vector<1x7x32x32xf32>
      tpu.vector_store %arg4[%c0_80, %c0_81, %c0_82, %c0_83], %67 {strides = array<i32>} : memref<1x7x32x32xf32, #tpu.memory_space<vmem>>, vector<1x7x32x32xf32>,
    } else {
    }
    %c0 = arith.constant 0 : index
    %c0_1 = arith.constant 0 : index
    %3 = vector.load %arg3[%c0, %c0_1] : memref<32x32xf32, #tpu.memory_space<vmem>>, vector<32x32xf32>
    %c0_2 = arith.constant 0 : index
    %c0_3 = arith.constant 0 : index
    %c0_4 = arith.constant 0 : index
    %c0_5 = arith.constant 0 : index
    %4 = vector.load %arg4[%c0_2, %c0_3, %c0_4, %c0_5] : memref<1x7x32x32xf32, #tpu.memory_space<vmem>>, vector<1x1x32x32xf32>
    %5 = vector.shape_cast %4 : vector<1x1x32x32xf32> to vector<32x32xf32>
    %c0_6 = arith.constant 0 : index
    %c0_7 = arith.constant 0 : index
    %c0_8 = arith.constant 0 : index
    %6 = vector.load %arg2[%c0_6, %c0_7, %c0_8] : memref<7x32x32xf32, #tpu.memory_space<vmem>>, vector<1x32x32xf32>
    %7 = vector.shape_cast %6 : vector<1x32x32xf32> to vector<32x32xf32>
    %cst = arith.constant dense<0.000000e+00> : vector<32x32xf32>
    %8 = tpu.matmul %7, %3, %cst {dimension_numbers = #tpu.dot_dimension_numbers<[1], [0], [0], [1], [0, 0, 1, 1], [], []>} : vector<32x32xf32>, vector<32x32xf32>, vector<32x32xf32> -> vector<32x32xf32>
    %9 = arith.addf %5, %8 : vector<32x32xf32>
    %c0_9 = arith.constant 0 : index
    %c0_10 = arith.constant 0 : index
    %c0_11 = arith.constant 0 : index
    %c0_12 = arith.constant 0 : index
    %10 = vector.load %arg4[%c0_9, %c0_10, %c0_11, %c0_12] : memref<1x7x32x32xf32, #tpu.memory_space<vmem>>, vector<1x1x32x32xf32>
    %11 = vector.shape_cast %10 : vector<1x1x32x32xf32> to vector<32x32xf32>
    %12 = vector.shape_cast %9 : vector<32x32xf32> to vector<1x1x32x32xf32>
    tpu.vector_store %arg4[%c0_9, %c0_10, %c0_11, %c0_12], %12 {strides = array<i32>} : memref<1x7x32x32xf32, #tpu.memory_space<vmem>>, vector<1x1x32x32xf32>,
    %c0_13 = arith.constant 0 : index
    %c1 = arith.constant 1 : index
    %c0_14 = arith.constant 0 : index
    %c0_15 = arith.constant 0 : index
    %13 = vector.load %arg4[%c0_13, %c1, %c0_14, %c0_15] : memref<1x7x32x32xf32, #tpu.memory_space<vmem>>, vector<1x1x32x32xf32>
    %14 = vector.shape_cast %13 : vector<1x1x32x32xf32> to vector<32x32xf32>
    %c1_16 = arith.constant 1 : index
    %c0_17 = arith.constant 0 : index
    %c0_18 = arith.constant 0 : index
    %15 = vector.load %arg2[%c1_16, %c0_17, %c0_18] : memref<7x32x32xf32, #tpu.memory_space<vmem>>, vector<1x32x32xf32>
    %16 = vector.shape_cast %15 : vector<1x32x32xf32> to vector<32x32xf32>
    %cst_19 = arith.constant dense<0.000000e+00> : vector<32x32xf32>
    %17 = tpu.matmul %16, %3, %cst_19 {dimension_numbers = #tpu.dot_dimension_numbers<[1], [0], [0], [1], [0, 0, 1, 1], [], []>} : vector<32x32xf32>, vector<32x32xf32>, vector<32x32xf32> -> vector<32x32xf32>
    %18 = arith.addf %14, %17 : vector<32x32xf32>
    %c0_20 = arith.constant 0 : index
    %c1_21 = arith.constant 1 : index
    %c0_22 = arith.constant 0 : index
    %c0_23 = arith.constant 0 : index
    %19 = vector.load %arg4[%c0_20, %c1_21, %c0_22, %c0_23] : memref<1x7x32x32xf32, #tpu.memory_space<vmem>>, vector<1x1x32x32xf32>
    %20 = vector.shape_cast %19 : vector<1x1x32x32xf32> to vector<32x32xf32>
    %21 = vector.shape_cast %18 : vector<32x32xf32> to vector<1x1x32x32xf32>
    tpu.vector_store %arg4[%c0_20, %c1_21, %c0_22, %c0_23], %21 {strides = array<i32>} : memref<1x7x32x32xf32, #tpu.memory_space<vmem>>, vector<1x1x32x32xf32>,
    %c0_24 = arith.constant 0 : index
    %c2 = arith.constant 2 : index
    %c0_25 = arith.constant 0 : index
    %c0_26 = arith.constant 0 : index
    %22 = vector.load %arg4[%c0_24, %c2, %c0_25, %c0_26] : memref<1x7x32x32xf32, #tpu.memory_space<vmem>>, vector<1x1x32x32xf32>
    %23 = vector.shape_cast %22 : vector<1x1x32x32xf32> to vector<32x32xf32>
    %c2_27 = arith.constant 2 : index
    %c0_28 = arith.constant 0 : index
    %c0_29 = arith.constant 0 : index
    %24 = vector.load %arg2[%c2_27, %c0_28, %c0_29] : memref<7x32x32xf32, #tpu.memory_space<vmem>>, vector<1x32x32xf32>
    %25 = vector.shape_cast %24 : vector<1x32x32xf32> to vector<32x32xf32>
    %cst_30 = arith.constant dense<0.000000e+00> : vector<32x32xf32>
    %26 = tpu.matmul %25, %3, %cst_30 {dimension_numbers = #tpu.dot_dimension_numbers<[1], [0], [0], [1], [0, 0, 1, 1], [], []>} : vector<32x32xf32>, vector<32x32xf32>, vector<32x32xf32> -> vector<32x32xf32>
    %27 = arith.addf %23, %26 : vector<32x32xf32>
    %c0_31 = arith.constant 0 : index
    %c2_32 = arith.constant 2 : index
    %c0_33 = arith.constant 0 : index
    %c0_34 = arith.constant 0 : index
    %28 = vector.load %arg4[%c0_31, %c2_32, %c0_33, %c0_34] : memref<1x7x32x32xf32, #tpu.memory_space<vmem>>, vector<1x1x32x32xf32>
    %29 = vector.shape_cast %28 : vector<1x1x32x32xf32> to vector<32x32xf32>
    %30 = vector.shape_cast %27 : vector<32x32xf32> to vector<1x1x32x32xf32>
    tpu.vector_store %arg4[%c0_31, %c2_32, %c0_33, %c0_34], %30 {strides = array<i32>} : memref<1x7x32x32xf32, #tpu.memory_space<vmem>>, vector<1x1x32x32xf32>,
    %c0_35 = arith.constant 0 : index
    %c3 = arith.constant 3 : index
    %c0_36 = arith.constant 0 : index
    %c0_37 = arith.constant 0 : index
    %31 = vector.load %arg4[%c0_35, %c3, %c0_36, %c0_37] : memref<1x7x32x32xf32, #tpu.memory_space<vmem>>, vector<1x1x32x32xf32>
    %32 = vector.shape_cast %31 : vector<1x1x32x32xf32> to vector<32x32xf32>
    %c3_38 = arith.constant 3 : index
    %c0_39 = arith.constant 0 : index
    %c0_40 = arith.constant 0 : index
    %33 = vector.load %arg2[%c3_38, %c0_39, %c0_40] : memref<7x32x32xf32, #tpu.memory_space<vmem>>, vector<1x32x32xf32>
    %34 = vector.shape_cast %33 : vector<1x32x32xf32> to vector<32x32xf32>
    %cst_41 = arith.constant dense<0.000000e+00> : vector<32x32xf32>
    %35 = tpu.matmul %34, %3, %cst_41 {dimension_numbers = #tpu.dot_dimension_numbers<[1], [0], [0], [1], [0, 0, 1, 1], [], []>} : vector<32x32xf32>, vector<32x32xf32>, vector<32x32xf32> -> vector<32x32xf32>
    %36 = arith.addf %32, %35 : vector<32x32xf32>
    %c0_42 = arith.constant 0 : index
    %c3_43 = arith.constant 3 : index
    %c0_44 = arith.constant 0 : index
    %c0_45 = arith.constant 0 : index
    %37 = vector.load %arg4[%c0_42, %c3_43, %c0_44, %c0_45] : memref<1x7x32x32xf32, #tpu.memory_space<vmem>>, vector<1x1x32x32xf32>
    %38 = vector.shape_cast %37 : vector<1x1x32x32xf32> to vector<32x32xf32>
    %39 = vector.shape_cast %36 : vector<32x32xf32> to vector<1x1x32x32xf32>
    tpu.vector_store %arg4[%c0_42, %c3_43, %c0_44, %c0_45], %39 {strides = array<i32>} : memref<1x7x32x32xf32, #tpu.memory_space<vmem>>, vector<1x1x32x32xf32>,
    %c0_46 = arith.constant 0 : index
    %c4 = arith.constant 4 : index
    %c0_47 = arith.constant 0 : index
    %c0_48 = arith.constant 0 : index
    %40 = vector.load %arg4[%c0_46, %c4, %c0_47, %c0_48] : memref<1x7x32x32xf32, #tpu.memory_space<vmem>>, vector<1x1x32x32xf32>
    %41 = vector.shape_cast %40 : vector<1x1x32x32xf32> to vector<32x32xf32>
    %c4_49 = arith.constant 4 : index
    %c0_50 = arith.constant 0 : index
    %c0_51 = arith.constant 0 : index
    %42 = vector.load %arg2[%c4_49, %c0_50, %c0_51] : memref<7x32x32xf32, #tpu.memory_space<vmem>>, vector<1x32x32xf32>
    %43 = vector.shape_cast %42 : vector<1x32x32xf32> to vector<32x32xf32>
    %cst_52 = arith.constant dense<0.000000e+00> : vector<32x32xf32>
    %44 = tpu.matmul %43, %3, %cst_52 {dimension_numbers = #tpu.dot_dimension_numbers<[1], [0], [0], [1], [0, 0, 1, 1], [], []>} : vector<32x32xf32>, vector<32x32xf32>, vector<32x32xf32> -> vector<32x32xf32>
    %45 = arith.addf %41, %44 : vector<32x32xf32>
    %c0_53 = arith.constant 0 : index
    %c4_54 = arith.constant 4 : index
    %c0_55 = arith.constant 0 : index
    %c0_56 = arith.constant 0 : index
    %46 = vector.load %arg4[%c0_53, %c4_54, %c0_55, %c0_56] : memref<1x7x32x32xf32, #tpu.memory_space<vmem>>, vector<1x1x32x32xf32>
    %47 = vector.shape_cast %46 : vector<1x1x32x32xf32> to vector<32x32xf32>
    %48 = vector.shape_cast %45 : vector<32x32xf32> to vector<1x1x32x32xf32>
    tpu.vector_store %arg4[%c0_53, %c4_54, %c0_55, %c0_56], %48 {strides = array<i32>} : memref<1x7x32x32xf32, #tpu.memory_space<vmem>>, vector<1x1x32x32xf32>,
    %c0_57 = arith.constant 0 : index
    %c5 = arith.constant 5 : index
    %c0_58 = arith.constant 0 : index
    %c0_59 = arith.constant 0 : index
    %49 = vector.load %arg4[%c0_57, %c5, %c0_58, %c0_59] : memref<1x7x32x32xf32, #tpu.memory_space<vmem>>, vector<1x1x32x32xf32>
    %50 = vector.shape_cast %49 : vector<1x1x32x32xf32> to vector<32x32xf32>
    %c5_60 = arith.constant 5 : index
    %c0_61 = arith.constant 0 : index
    %c0_62 = arith.constant 0 : index
    %51 = vector.load %arg2[%c5_60, %c0_61, %c0_62] : memref<7x32x32xf32, #tpu.memory_space<vmem>>, vector<1x32x32xf32>
    %52 = vector.shape_cast %51 : vector<1x32x32xf32> to vector<32x32xf32>
    %cst_63 = arith.constant dense<0.000000e+00> : vector<32x32xf32>
    %53 = tpu.matmul %52, %3, %cst_63 {dimension_numbers = #tpu.dot_dimension_numbers<[1], [0], [0], [1], [0, 0, 1, 1], [], []>} : vector<32x32xf32>, vector<32x32xf32>, vector<32x32xf32> -> vector<32x32xf32>
    %54 = arith.addf %50, %53 : vector<32x32xf32>
    %c0_64 = arith.constant 0 : index
    %c5_65 = arith.constant 5 : index
    %c0_66 = arith.constant 0 : index
    %c0_67 = arith.constant 0 : index
    %55 = vector.load %arg4[%c0_64, %c5_65, %c0_66, %c0_67] : memref<1x7x32x32xf32, #tpu.memory_space<vmem>>, vector<1x1x32x32xf32>
    %56 = vector.shape_cast %55 : vector<1x1x32x32xf32> to vector<32x32xf32>
    %57 = vector.shape_cast %54 : vector<32x32xf32> to vector<1x1x32x32xf32>
    tpu.vector_store %arg4[%c0_64, %c5_65, %c0_66, %c0_67], %57 {strides = array<i32>} : memref<1x7x32x32xf32, #tpu.memory_space<vmem>>, vector<1x1x32x32xf32>,
    %c0_68 = arith.constant 0 : index
    %c6 = arith.constant 6 : index
    %c0_69 = arith.constant 0 : index
    %c0_70 = arith.constant 0 : index
    %58 = vector.load %arg4[%c0_68, %c6, %c0_69, %c0_70] : memref<1x7x32x32xf32, #tpu.memory_space<vmem>>, vector<1x1x32x32xf32>
    %59 = vector.shape_cast %58 : vector<1x1x32x32xf32> to vector<32x32xf32>
    %c6_71 = arith.constant 6 : index
    %c0_72 = arith.constant 0 : index
    %c0_73 = arith.constant 0 : index
    %60 = vector.load %arg2[%c6_71, %c0_72, %c0_73] : memref<7x32x32xf32, #tpu.memory_space<vmem>>, vector<1x32x32xf32>
    %61 = vector.shape_cast %60 : vector<1x32x32xf32> to vector<32x32xf32>
    %cst_74 = arith.constant dense<0.000000e+00> : vector<32x32xf32>
    %62 = tpu.matmul %61, %3, %cst_74 {dimension_numbers = #tpu.dot_dimension_numbers<[1], [0], [0], [1], [0, 0, 1, 1], [], []>} : vector<32x32xf32>, vector<32x32xf32>, vector<32x32xf32> -> vector<32x32xf32>
    %63 = arith.addf %59, %62 : vector<32x32xf32>
    %c0_75 = arith.constant 0 : index
    %c6_76 = arith.constant 6 : index
    %c0_77 = arith.constant 0 : index
    %c0_78 = arith.constant 0 : index
    %64 = vector.load %arg4[%c0_75, %c6_76, %c0_77, %c0_78] : memref<1x7x32x32xf32, #tpu.memory_space<vmem>>, vector<1x1x32x32xf32>
    %65 = vector.shape_cast %64 : vector<1x1x32x32xf32> to vector<32x32xf32>
    %66 = vector.shape_cast %63 : vector<32x32xf32> to vector<1x1x32x32xf32>
    tpu.vector_store %arg4[%c0_75, %c6_76, %c0_77, %c0_78], %66 {strides = array<i32>} : memref<1x7x32x32xf32, #tpu.memory_space<vmem>>, vector<1x1x32x32xf32>,
    return
  }
  func.func @transform_0(%arg0: i32, %arg1: i32) -> (i32, i32, i32) {
    %c1_i32 = arith.constant 1 : i32
    %0 = arith.muli %arg0, %c1_i32 : i32
    %1 = arith.addi %0, %arg1 : i32
    %c0_i32 = arith.constant 0 : i32
    %c0_i32_0 = arith.constant 0 : i32
    %c0_i32_1 = arith.constant 0 : i32
    return %c0_i32, %c0_i32_0, %1 : i32, i32, i32
  }
  func.func @transform_1(%arg0: i32, %arg1: i32) -> (i32, i32) {
    %c1_i32 = arith.constant 1 : i32
    %0 = arith.muli %arg0, %c1_i32 : i32
    %1 = arith.addi %0, %arg1 : i32
    %c0_i32 = arith.constant 0 : i32
    %c0_i32_0 = arith.constant 0 : i32
    return %1, %c0_i32 : i32, i32
  }
  func.func @transform_2(%arg0: i32, %arg1: i32) -> (i32, i32, i32, i32) {
    %c0_i32 = arith.constant 0 : i32
    %c0_i32_0 = arith.constant 0 : i32
    %c0_i32_1 = arith.constant 0 : i32
    %c0_i32_2 = arith.constant 0 : i32
    return %arg0, %c0_i32, %c0_i32_0, %c0_i32_1 : i32, i32, i32, i32
  }
}

</mosaic_0001>

<bundles_post_ra>
// kernel: _lambda_.1
= control target key start
LH: loop header
LB: loop body
LE: loop exit
PB: predicated region body
PF: predicated region fallthrough
CT: control target
= control target key end

     0   :  { %7 = vsyncpa [#allocation3], 0  ;;  %s1221_s9 = smov [#allocation2]   ;;  %s1636_s0 = inlined_call_operand.hbm [shape: f32[7,32,32], index: 0, kind: input, shape index: {}]   ;;  %s1637_s1 = inlined_call_operand.vmem [shape: f32[32,32], index: 1, kind: input, shape index: {}]   ;;  %s1638_s2 = inlined_call_operand.vmem [shape: f32[1,7,32,32], index: 2, kind: output, shape index: {}]  }
   0x1   :  { %s16_s10 = sshll.u32 %s1221_s9, 4  ;;  %s1197_s13 = scalar_lea.hbm %s1636_s0, 3584  ;;  %s17_s10 = int_to_ptr.vmem [resolvable:$true] %s16_s10 }
   0x2   :  { %p1198_p0 = scmp.ne.s32.totalorder %s1636_s0, %s1197_s13  ;;  %p1201_p1 = scmp.lt.u32.totalorder %s1197_s13, %s1636_s0 }
   0x4   :  { %p1203_p2 = pnand %p1201_p1, %p1198_p0 }
   0x6   :  { %1206 = shalt.err (!%p1203_p2)
}
   0x7   :  { %s1207_s18 = scalar_lea.vmem %s17_s10, 3584  ;;  %p1212_p4 = scmp.lt.s32.totalorder %s17_s10, %s17_s10 }
   0x8   :  { %p1208_p3 = scmp.ne.s32.totalorder %s17_s10, %s1207_s18  ;;  %p1213_p5 = scmp.lt.s32.totalorder %s1207_s18, %s1207_s18 }
   0xa   :  { %p1214_p6 = por %p1213_p5, %p1212_p4 }
   0xc   :  { %p1215_p7 = pnand %p1214_p6, %p1208_p3 }
   0xe   :  { %1218 = shalt.err (!%p1215_p7)
}
   0xf   :  { %s1222_s19 = smov 128   ;;  %s1223_s20 = smov 8  }
  0x10   :  { %22 = dma.hbm_to_vmem [thread:$0]  %s1636_s0, 3584, %s17_s10, [#allocation3], %s1222_s19, %s1222_s19, %s1223_s20  }
  0x11   :  { %1219 = dma.done.wait [#allocation3], 3584  }
  0x12   :  { %1220 = vsyncadd [#allocation3], 4294963712  ;;  %vm55_vm0 = vcmask 261120   ;;  %v1224_v0 = vmov 0.0   ;;  %v84_v1 = vld [vmem:[%s1637_s1] sm:$0xff]  ;;  %v85_v2 = vld [vmem:[%s1637_s1 + $0x8] sm:$0xff] }
  0x13   :  { %57 = vst.msk [vmem:[%s1638_s2 + $0x8] sm:$0xff] %vm55_vm0, %v1224_v0  ;;  %56 = vst.msk [vmem:[%s1638_s2] sm:$0xff] %vm55_vm0, %v1224_v0  ;;  %v86_v3 = vld [vmem:[%s1637_s1 + $0x10] sm:$0xff]  ;;  %v1373_v4 = vpack.c.bf16 %v85_v2, %v84_v1  ;;  %v87_v5 = vld [vmem:[%s1637_s1 + $0x18] sm:$0xff] }
  0x14   :  { %58 = vst.msk [vmem:[%s1638_s2 + $0x10] sm:$0xff] %vm55_vm0, %v1224_v0  ;;  %59 = vst.msk [vmem:[%s1638_s2 + $0x18] sm:$0xff] %vm55_vm0, %v1224_v0  ;;  %v92_v6 = vld [vmem:[#allocation2] sm:$0xff]  ;;  %v1378_v8 = vpack.c.bf16 %v87_v5, %v86_v3  ;;  %v93_v9 = vld [vmem:[#allocation2 + $0x8] sm:$0xff] }
  0x15   :  { %60 = vst.msk [vmem:[%s1638_s2 + $0x20] sm:$0xff] %vm55_vm0, %v1224_v0  ;;  %61 = vst.msk [vmem:[%s1638_s2 + $0x28] sm:$0xff] %vm55_vm0, %v1224_v0  ;;  %v208_v7 = vld [vmem:[#allocation2 + $0x20] sm:$0xff]  ;;  %1043 = vmatprep.mubr.msk.f32.mxu0 %vm55_vm0, %v92_v6  ;;  %1134 = vmatprep.subr.bf16.mxu0 %v1373_v4  ;;  %v209_v10 = vld [vmem:[#allocation2 + $0x28] sm:$0xff] }
  0x16   :  { %62 = vst.msk [vmem:[%s1638_s2 + $0x30] sm:$0xff] %vm55_vm0, %v1224_v0  ;;  %63 = vst.msk [vmem:[%s1638_s2 + $0x38] sm:$0xff] %vm55_vm0, %v1224_v0  ;;  %1057 = vmatprep.mubr.msk.f32.mxu1 %vm55_vm0, %v208_v7  ;;  %1142 = vmatprep.subr.bf16.mxu1 %v1373_v4  ;;  %v94_v11 = vld [vmem:[#allocation2 + $0x10] sm:$0xff]  ;;  %v95_v13 = vld [vmem:[#allocation2 + $0x18] sm:$0xff] }
  0x17   :  { %64 = vst.msk [vmem:[%s1638_s2 + $0x40] sm:$0xff] %vm55_vm0, %v1224_v0  ;;  %65 = vst.msk [vmem:[%s1638_s2 + $0x48] sm:$0xff] %vm55_vm0, %v1224_v0  ;;  %1136 = vmatpush3.bf16.msra.mxu0 %v1373_v4  ;;  %1144 = vmatpush3.bf16.msra.mxu1 %v1373_v4  ;;  %v210_v12 = vld [vmem:[#allocation2 + $0x30] sm:$0xff]  ;;  %v211_v14 = vld [vmem:[#allocation2 + $0x38] sm:$0xff] }
  0x18   :  { %66 = vst.msk [vmem:[%s1638_s2 + $0x50] sm:$0xff] %vm55_vm0, %v1224_v0  ;;  %67 = vst.msk [vmem:[%s1638_s2 + $0x58] sm:$0xff] %vm55_vm0, %v1224_v0  ;;  %1138 = vmatprep.subr.bf16.mxu0 %v1378_v8  ;;  %1146 = vmatprep.subr.bf16.mxu1 %v1378_v8  ;;  %v323_v15 = vld [vmem:[#allocation2 + $0x40] sm:$0xff]  ;;  %v324_v17 = vld [vmem:[#allocation2 + $0x48] sm:$0xff] }
  0x19   :  { %68 = vst.msk [vmem:[%s1638_s2 + $0x60] sm:$0xff] %vm55_vm0, %v1224_v0  ;;  %69 = vst.msk [vmem:[%s1638_s2 + $0x68] sm:$0xff] %vm55_vm0, %v1224_v0  ;;  %v438_v16 = vld [vmem:[#allocation2 + $0x60] sm:$0xff]  ;;  %v439_v18 = vld [vmem:[#allocation2 + $0x68] sm:$0xff] }
  0x1a   :  { %70 = vst.msk [vmem:[%s1638_s2 + $0x70] sm:$0xff] %vm55_vm0, %v1224_v0  ;;  %71 = vst.msk [vmem:[%s1638_s2 + $0x78] sm:$0xff] %vm55_vm0, %v1224_v0  ;;  %v325_v19 = vld [vmem:[#allocation2 + $0x50] sm:$0xff]  ;;  %v326_v21 = vld [vmem:[#allocation2 + $0x58] sm:$0xff] }
  0x1b   :  { %72 = vst.msk [vmem:[%s1638_s2 + $0x80] sm:$0xff] %vm55_vm0, %v1224_v0  ;;  %73 = vst.msk [vmem:[%s1638_s2 + $0x88] sm:$0xff] %vm55_vm0, %v1224_v0  ;;  %1140 = vmatpush3.bf16.msra.mxu0 %v1378_v8  ;;  %1148 = vmatpush3.bf16.msra.mxu1 %v1378_v8  ;;  %v440_v20 = vld [vmem:[#allocation2 + $0x70] sm:$0xff]  ;;  %v441_v22 = vld [vmem:[#allocation2 + $0x78] sm:$0xff] }
  0x1c   :  { %74 = vst.msk [vmem:[%s1638_s2 + $0x90] sm:$0xff] %vm55_vm0, %v1224_v0  ;;  %75 = vst.msk [vmem:[%s1638_s2 + $0x98] sm:$0xff] %vm55_vm0, %v1224_v0  ;;  %1150 = vmatprep.subr.bf16.mxu0 %v1373_v4  ;;  %1158 = vmatprep.subr.bf16.mxu1 %v1373_v4  ;;  %v553_v23 = vld [vmem:[#allocation2 + $0x80] sm:$0xff]  ;;  %v554_v25 = vld [vmem:[#allocation2 + $0x88] sm:$0xff] }
  0x1d   :  { %76 = vst.msk [vmem:[%s1638_s2 + $0xa0] sm:$0xff] %vm55_vm0, %v1224_v0  ;;  %77 = vst.msk [vmem:[%s1638_s2 + $0xa8] sm:$0xff] %vm55_vm0, %v1224_v0  ;;  %v668_v24 = vld [vmem:[#allocation2 + $0xa0] sm:$0xff]  ;;  %v669_v26 = vld [vmem:[#allocation2 + $0xa8] sm:$0xff] }
  0x1e   :  { %78 = vst.msk [vmem:[%s1638_s2 + $0xb0] sm:$0xff] %vm55_vm0, %v1224_v0  ;;  %79 = vst.msk [vmem:[%s1638_s2 + $0xb8] sm:$0xff] %vm55_vm0, %v1224_v0  ;;  %1044 = vmatmul.mubr.msk.f32.vlgmr.msra.gmra.mrb[0].mxu0 %vm55_vm0, %v93_v9  ;;  %1058 = vmatmul.mubr.msk.f32.vlgmr.msra.gmra.mrb[0].mxu1 %vm55_vm0, %v209_v10  ;;  %v555_v27 = vld [vmem:[#allocation2 + $0x90] sm:$0xff]  ;;  %v556_v29 = vld [vmem:[#allocation2 + $0x98] sm:$0xff] }
  0x1f   :  { %80 = vst.msk [vmem:[%s1638_s2 + $0xc0] sm:$0xff] %vm55_vm0, %v1224_v0  ;;  %81 = vst.msk [vmem:[%s1638_s2 + $0xc8] sm:$0xff] %vm55_vm0, %v1224_v0  ;;  %1152 = vmatpush3.bf16.msra.mxu0 %v1373_v4  ;;  %1160 = vmatpush3.bf16.msra.mxu1 %v1373_v4  ;;  %v670_v28 = vld [vmem:[#allocation2 + $0xb0] sm:$0xff]  ;;  %v671_v30 = vld [vmem:[#allocation2 + $0xb8] sm:$0xff] }
  0x20   :  { %82 = vst.msk [vmem:[%s1638_s2 + $0xd0] sm:$0xff] %vm55_vm0, %v1224_v0  ;;  %83 = vst.msk [vmem:[%s1638_s2 + $0xd8] sm:$0xff] %vm55_vm0, %v1224_v0  ;;  %1046 = vmatprep.mubr.msk.f32.mxu0 %vm55_vm0, %v94_v11  ;;  %1060 = vmatprep.mubr.msk.f32.mxu1 %vm55_vm0, %v210_v12  ;;  %v783_v31 = vld [vmem:[#allocation2 + $0xc0] sm:$0xff]  ;;  %v785_v32 = vld [vmem:[#allocation2 + $0xd0] sm:$0xff] }
  0x21   :  { %1154 = vmatprep.subr.bf16.mxu0 %v1378_v8  ;;  %1162 = vmatprep.subr.bf16.mxu1 %v1378_v8  ;;  %v784_v33 = vld [vmem:[#allocation2 + $0xc8] sm:$0xff]  ;;  %v786_v34 = vld [vmem:[#allocation2 + $0xd8] sm:$0xff]  ;;  %v88_v37 = vld [vmem:[%s1638_s2] sm:$0xff] }
  0x22   :  { %1047 = vmatmul.mubr.msk.f32.gmra.mrb[2].mxu0 %vm55_vm0, %v95_v13  ;;  %1061 = vmatmul.mubr.msk.f32.gmra.mrb[2].mxu1 %vm55_vm0, %v211_v14  ;;  %v89_v35 = vld [vmem:[%s1638_s2 + $0x8] sm:$0xff]  ;;  %v907_v38 = vld [vmem:[%s1638_s2 + $0x20] sm:$0xff]  ;;  %v91_v47 = vld [vmem:[%s1638_s2 + $0x18] sm:$0xff] }
  0x23   :  { %1156 = vmatpush3.bf16.msra.mxu0 %v1378_v8  ;;  %1164 = vmatpush3.bf16.msra.mxu1 %v1378_v8  ;;  %v908_v36 = vld [vmem:[%s1638_s2 + $0x28] sm:$0xff]  ;;  %v910_v48 = vld [vmem:[%s1638_s2 + $0x38] sm:$0xff]  ;;  %v90_v49 = vld [vmem:[%s1638_s2 + $0x10] sm:$0xff] }
  0x24   :  { %1071 = vmatprep.mubr.msk.f32.mxu0 %vm55_vm0, %v323_v15  ;;  %1085 = vmatprep.mubr.msk.f32.mxu1 %vm55_vm0, %v438_v16  ;;  %v909_v50 = vld [vmem:[%s1638_s2 + $0x30] sm:$0xff]  ;;  %v920_v59 = vld [vmem:[%s1638_s2 + $0x48] sm:$0xff]  ;;  %v919_v61 = vld [vmem:[%s1638_s2 + $0x40] sm:$0xff] }
  0x25   :  { %1166 = vmatprep.subr.bf16.mxu0 %v1373_v4  ;;  %1174 = vmatprep.subr.bf16.mxu1 %v1373_v4  ;;  %v932_v60 = vld [vmem:[%s1638_s2 + $0x68] sm:$0xff]  ;;  %v931_v62 = vld [vmem:[%s1638_s2 + $0x60] sm:$0xff]  ;;  %v922_v7 = vld [vmem:[%s1638_s2 + $0x58] sm:$0xff] }
  0x26   :  { %1072 = vmatmul.mubr.msk.f32.vlgmr.msra.gmra.mrb[4].mxu0 %vm55_vm0, %v324_v17  ;;  %1086 = vmatmul.mubr.msk.f32.vlgmr.msra.gmra.mrb[4].mxu1 %vm55_vm0, %v439_v18  ;;  %v921_v9 = vld [vmem:[%s1638_s2 + $0x50] sm:$0xff] }
  0x27   :  { %1168 = vmatpush3.bf16.msra.mxu0 %v1373_v4  ;;  %1176 = vmatpush3.bf16.msra.mxu1 %v1373_v4  ;;  %v933_v10 = vld [vmem:[%s1638_s2 + $0x70] sm:$0xff] }
  0x28   :  { %1074 = vmatprep.mubr.msk.f32.mxu0 %vm55_vm0, %v325_v19  ;;  %1088 = vmatprep.mubr.msk.f32.mxu1 %vm55_vm0, %v440_v20  ;;  %v944_v19 = vld [vmem:[%s1638_s2 + $0x88] sm:$0xff] }
  0x29   :  { %1170 = vmatprep.subr.bf16.mxu0 %v1378_v8  ;;  %1178 = vmatprep.subr.bf16.mxu1 %v1378_v8  ;;  %v956_v20 = vld [vmem:[%s1638_s2 + $0xa8] sm:$0xff] }
  0x2a   :  { %1075 = vmatmul.mubr.msk.f32.gmra.mrb[6].mxu0 %vm55_vm0, %v326_v21  ;;  %1089 = vmatmul.mubr.msk.f32.gmra.mrb[6].mxu1 %vm55_vm0, %v441_v22  ;;  %v943_v21 = vld [vmem:[%s1638_s2 + $0x80] sm:$0xff] }
  0x2b   :  { %1172 = vmatpush3.bf16.msra.mxu0 %v1378_v8  ;;  %1180 = vmatpush3.bf16.msra.mxu1 %v1378_v8  ;;  %v955_v22 = vld [vmem:[%s1638_s2 + $0xa0] sm:$0xff] }
  0x2c   :  { %1099 = vmatprep.mubr.msk.f32.mxu0 %vm55_vm0, %v553_v23  ;;  %1113 = vmatprep.mubr.msk.f32.mxu1 %vm55_vm0, %v668_v24 }
  0x2d   :  { %1182 = vmatprep.subr.bf16.mxu0 %v1373_v4  ;;  %1189 = vmatprep.subr.bf16.mxu1 %v1373_v4 }
  0x2e   :  { %1100 = vmatmul.mubr.msk.f32.vlgmr.msra.gmra.mrb[8].mxu0 %vm55_vm0, %v554_v25  ;;  %1114 = vmatmul.mubr.msk.f32.vlgmr.msra.gmra.mrb[8].mxu1 %vm55_vm0, %v669_v26 }
  0x2f   :  { %1184 = vmatpush3.bf16.msra.mxu0 %v1373_v4  ;;  %1191 = vmatpush3.bf16.msra.mxu1 %v1373_v4 }
  0x30   :  { %1102 = vmatprep.mubr.msk.f32.mxu0 %vm55_vm0, %v555_v27  ;;  %1116 = vmatprep.mubr.msk.f32.mxu1 %vm55_vm0, %v670_v28 }
  0x31   :  { %1186 = vmatprep.subr.bf16.mxu0 %v1378_v8  ;;  %1190 = vmatprep.subr.bf16.mxu1 %v1378_v8 }
  0x32   :  { %1103 = vmatmul.mubr.msk.f32.gmra.mrb[10].mxu0 %vm55_vm0, %v556_v29  ;;  %1117 = vmatmul.mubr.msk.f32.gmra.mrb[10].mxu1 %vm55_vm0, %v671_v30 }
  0x33   :  { %1188 = vmatpush3.bf16.msra.mxu0 %v1378_v8  ;;  %1192 = vmatpush3.bf16.msra.mxu1 %v1378_v8  ;;  %v934_v8 = vld [vmem:[%s1638_s2 + $0x78] sm:$0xff] }
  0x34   :  { %1127 = vmatprep.mubr.msk.f32.mxu0 %vm55_vm0, %v783_v31  ;;  %1130 = vmatprep.mubr.msk.f32.mxu1 %vm55_vm0, %v785_v32  ;;  %v946_v31 = vld [vmem:[%s1638_s2 + $0x98] sm:$0xff] }
  0x35   :  { %v958_v32 = vld [vmem:[%s1638_s2 + $0xb8] sm:$0xff] }
  0x36   :  { %1128 = vmatmul.mubr.msk.f32.vlgmr.msra.gmra.mrb[12].mxu0 %vm55_vm0, %v784_v33  ;;  %1131 = vmatmul.mubr.msk.f32.vlgmr.msra.gmra.mrb[12].mxu1 %vm55_vm0, %v786_v34  ;;  %v945_v33 = vld [vmem:[%s1638_s2 + $0x90] sm:$0xff] }
  0x37   :  { %v957_v34 = vld [vmem:[%s1638_s2 + $0xb0] sm:$0xff] }
  0xf1   :  { %v1045_v39 = vpop.f32.mrb[0].mxu0  ;;  %v1059_v40 = vpop.f32.mrb[0].mxu1 }
  0xf2   :  { %v195_v41 = vadd.f32 %v1045_v39, %v89_v35  ;;  %v310_v42 = vadd.f32 %v1059_v40, %v908_v36  ;;  %v175_v43 = vpop.f32.mrb[1].mxu0  ;;  %v290_v44 = vpop.f32.mrb[1].mxu1 }
  0xf3   :  { %v194_v45 = vadd.f32 %v175_v43, %v88_v37  ;;  %v309_v46 = vadd.f32 %v907_v38, %v290_v44  ;;  %v968_v43 = vld [vmem:[%s1638_s2 + $0xc8] sm:$0xff]  ;;  %v970_v44 = vld [vmem:[%s1638_s2 + $0xd8] sm:$0xff] }
  0xf4   :  { %199 = vst.msk [vmem:[%s1638_s2 + $0x8] sm:$0xff] %vm55_vm0, %v195_v41  ;;  %916 = vst.msk [vmem:[%s1638_s2 + $0x28] sm:$0xff] %vm55_vm0, %v310_v42 }
  0xf5   :  { %198 = vst.msk [vmem:[%s1638_s2] sm:$0xff] %vm55_vm0, %v194_v45  ;;  %915 = vst.msk [vmem:[%s1638_s2 + $0x20] sm:$0xff] %vm55_vm0, %v309_v46  ;;  %v1048_v51 = vpop.f32.mrb[2].mxu0  ;;  %v1062_v52 = vpop.f32.mrb[2].mxu1  ;;  %v967_v45 = vld [vmem:[%s1638_s2 + $0xc0] sm:$0xff]  ;;  %v969_v46 = vld [vmem:[%s1638_s2 + $0xd0] sm:$0xff] }
  0xf6   :  { %v197_v53 = vadd.f32 %v1048_v51, %v91_v47  ;;  %v312_v54 = vadd.f32 %v1062_v52, %v910_v48  ;;  %v185_v55 = vpop.f32.mrb[3].mxu0  ;;  %v300_v56 = vpop.f32.mrb[3].mxu1 }
  0xf7   :  { %v196_v57 = vadd.f32 %v185_v55, %v90_v49  ;;  %v311_v58 = vadd.f32 %v909_v50, %v300_v56 }
  0xf8   :  { %201 = vst.msk [vmem:[%s1638_s2 + $0x18] sm:$0xff] %vm55_vm0, %v197_v53  ;;  %918 = vst.msk [vmem:[%s1638_s2 + $0x38] sm:$0xff] %vm55_vm0, %v312_v54 }
  0xf9   :  { %200 = vst.msk [vmem:[%s1638_s2 + $0x10] sm:$0xff] %vm55_vm0, %v196_v57  ;;  %917 = vst.msk [vmem:[%s1638_s2 + $0x30] sm:$0xff] %vm55_vm0, %v311_v58  ;;  %v1073_v63 = vpop.f32.mrb[4].mxu0  ;;  %v1087_v0 = vpop.f32.mrb[4].mxu1 }
  0xfa   :  { %v425_v1 = vadd.f32 %v1073_v63, %v920_v59  ;;  %v540_v2 = vadd.f32 %v1087_v0, %v932_v60  ;;  %v405_v3 = vpop.f32.mrb[5].mxu0  ;;  %v520_v4 = vpop.f32.mrb[5].mxu1 }
  0xfb   :  { %v424_v5 = vadd.f32 %v919_v61, %v405_v3  ;;  %v539_v6 = vadd.f32 %v931_v62, %v520_v4 }
  0xfc   :  { %928 = vst.msk [vmem:[%s1638_s2 + $0x48] sm:$0xff] %vm55_vm0, %v425_v1  ;;  %940 = vst.msk [vmem:[%s1638_s2 + $0x68] sm:$0xff] %vm55_vm0, %v540_v2 }
  0xfd   :  { %927 = vst.msk [vmem:[%s1638_s2 + $0x40] sm:$0xff] %vm55_vm0, %v424_v5  ;;  %939 = vst.msk [vmem:[%s1638_s2 + $0x60] sm:$0xff] %vm55_vm0, %v539_v6  ;;  %v1076_v11 = vpop.f32.mrb[6].mxu0  ;;  %v1090_v12 = vpop.f32.mrb[6].mxu1 }
  0xfe   :  { %v427_v13 = vadd.f32 %v1076_v11, %v922_v7  ;;  %v542_v14 = vadd.f32 %v1090_v12, %v934_v8  ;;  %v415_v15 = vpop.f32.mrb[7].mxu0  ;;  %v530_v16 = vpop.f32.mrb[7].mxu1 }
  0xff   :  { %v426_v17 = vadd.f32 %v921_v9, %v415_v15  ;;  %v541_v18 = vadd.f32 %v933_v10, %v530_v16 }
 0x100   :  { %930 = vst.msk [vmem:[%s1638_s2 + $0x58] sm:$0xff] %vm55_vm0, %v427_v13  ;;  %942 = vst.msk [vmem:[%s1638_s2 + $0x78] sm:$0xff] %vm55_vm0, %v542_v14 }
 0x101   :  { %929 = vst.msk [vmem:[%s1638_s2 + $0x50] sm:$0xff] %vm55_vm0, %v426_v17  ;;  %941 = vst.msk [vmem:[%s1638_s2 + $0x70] sm:$0xff] %vm55_vm0, %v541_v18  ;;  %v1101_v23 = vpop.f32.mrb[8].mxu0  ;;  %v1115_v24 = vpop.f32.mrb[8].mxu1 }
 0x102   :  { %v655_v25 = vadd.f32 %v1101_v23, %v944_v19  ;;  %v770_v26 = vadd.f32 %v1115_v24, %v956_v20  ;;  %v635_v27 = vpop.f32.mrb[9].mxu0  ;;  %v750_v28 = vpop.f32.mrb[9].mxu1 }
 0x103   :  { %v654_v29 = vadd.f32 %v943_v21, %v635_v27  ;;  %v769_v30 = vadd.f32 %v955_v22, %v750_v28 }
 0x104   :  { %952 = vst.msk [vmem:[%s1638_s2 + $0x88] sm:$0xff] %vm55_vm0, %v655_v25  ;;  %964 = vst.msk [vmem:[%s1638_s2 + $0xa8] sm:$0xff] %vm55_vm0, %v770_v26 }
 0x105   :  { %951 = vst.msk [vmem:[%s1638_s2 + $0x80] sm:$0xff] %vm55_vm0, %v654_v29  ;;  %963 = vst.msk [vmem:[%s1638_s2 + $0xa0] sm:$0xff] %vm55_vm0, %v769_v30  ;;  %v1104_v35 = vpop.f32.mrb[10].mxu0  ;;  %v1118_v36 = vpop.f32.mrb[10].mxu1 }
 0x106   :  { %v657_v37 = vadd.f32 %v1104_v35, %v946_v31  ;;  %v772_v38 = vadd.f32 %v1118_v36, %v958_v32  ;;  %v645_v39 = vpop.f32.mrb[11].mxu0  ;;  %v760_v40 = vpop.f32.mrb[11].mxu1 }
 0x107   :  { %v656_v41 = vadd.f32 %v945_v33, %v645_v39  ;;  %v771_v42 = vadd.f32 %v957_v34, %v760_v40 }
 0x108   :  { %954 = vst.msk [vmem:[%s1638_s2 + $0x98] sm:$0xff] %vm55_vm0, %v657_v37  ;;  %966 = vst.msk [vmem:[%s1638_s2 + $0xb8] sm:$0xff] %vm55_vm0, %v772_v38 }
 0x109   :  { %953 = vst.msk [vmem:[%s1638_s2 + $0x90] sm:$0xff] %vm55_vm0, %v656_v41  ;;  %965 = vst.msk [vmem:[%s1638_s2 + $0xb0] sm:$0xff] %vm55_vm0, %v771_v42  ;;  %v1129_v47 = vpop.f32.mrb[12].mxu0  ;;  %v1132_v48 = vpop.f32.mrb[12].mxu1 }
 0x10a   :  { %v885_v49 = vadd.f32 %v1129_v47, %v968_v43  ;;  %v887_v50 = vadd.f32 %v1132_v48, %v970_v44  ;;  %v865_v51 = vpop.f32.mrb[13].mxu0  ;;  %v875_v52 = vpop.f32.mrb[13].mxu1 }
 0x10b   :  { %v884_v53 = vadd.f32 %v967_v45, %v865_v51  ;;  %v886_v54 = vadd.f32 %v969_v46, %v875_v52 }
 0x10c   :  { %976 = vst.msk [vmem:[%s1638_s2 + $0xc8] sm:$0xff] %vm55_vm0, %v885_v49  ;;  %978 = vst.msk [vmem:[%s1638_s2 + $0xd8] sm:$0xff] %vm55_vm0, %v887_v50 }
 0x10d   :  { %975 = vst.msk [vmem:[%s1638_s2 + $0xc0] sm:$0xff] %vm55_vm0, %v884_v53  ;;  %977 = vst.msk [vmem:[%s1638_s2 + $0xd0] sm:$0xff] %vm55_vm0, %v886_v54 }
 0x10e   :  { %896 = vsyncpa [#allocation3], 1 }

</bundles_post_ra>
